<compile_context>
chip_gen: v5e
topology: v5e:2x2
jax: 0.10.0
libtpu: 0.0.40
codegen_flags: <defaults>
</compile_context>

<pallas_src>
import jax
import jax.numpy as jnp
from jax.experimental import pallas as pl
from jax.experimental.pallas import tpu as pltpu


def ssam_kernel(x_ref, w_ref, sm_ref, bm_ref, sa_ref, ba_ref, g_ref, o_ref):
    # x_ref / o_ref: (1, C, TH, W) VMEM blocks.  g_ref: (1,) gamma in SMEM.
    xb = x_ref[0]                                             # (C, TH, W)

    # F.max_pool2d(x,[1,W]) / F.avg_pool2d(x,[1,W]) -> (C, TH).  Keep the f32
    # upcast inside the reductions so no full f32 copy of the block stays live
    # across the matmul / softmax.
    max_p = jnp.max(xb, axis=-1).astype(jnp.float32)          # (C, TH)
    avg_p = jnp.mean(xb.astype(jnp.float32), axis=-1)         # (C, TH)

    # Shared 1x1 conv == channel matmul.  Fuse both pooled tensors into one MXU
    # call:  W @ [max | avg] = [W@max | W@avg].
    th = max_p.shape[-1]
    pooled = jnp.concatenate([max_p, avg_p], axis=-1)         # (C, 2*TH)
    z = jnp.dot(w_ref[...], pooled, preferred_element_type=jnp.float32)

    # BatchNorm2d (eval mode) with the conv bias folded into the shift:
    #   (Wx + b) * s + t  ==  (Wx) * s + (b*s + t)
    mp = z[:, :th] * sm_ref[...] + bm_ref[...]                # (C, TH)
    ap = z[:, th:] * sa_ref[...] + ba_ref[...]                # (C, TH)

    # softmax over the channel axis of (mp * ap); exp on EUP, approx reciprocal
    # instead of a VPU divide.
    s = mp * ap
    s = s - jnp.max(s, axis=0, keepdims=True)
    e = jnp.exp(s)
    att = e * pl.reciprocal(jnp.sum(e, axis=0, keepdims=True), approx=True)

    # f_scale = att*mp + att*ap ;  out = relu(gamma*f_scale + (1-gamma)*x)
    f_scale = att * (mp + ap)                                 # (C, TH)
    g = g_ref[0]
    out = g * f_scale[:, :, None] + (1.0 - g) * x_ref[0].astype(jnp.float32)
    o_ref[0] = jnp.maximum(out, 0.0).astype(o_ref.dtype)


def _pick_h_tile(C, H, W, budget_bytes):
    """Largest TH that divides H, is sublane-aligned (or == H), and keeps a
    single f32 x-block under `budget_bytes` (conservative for v5e/v6e/v7x)."""
    per_row = C * W * 4
    cands = [t for t in range(1, H + 1)
             if H % t == 0 and (t % 8 == 0 or t == H)]
    fitting = [t for t in cands if t * per_row <= budget_bytes]
    return max(fitting) if fitting else min(cands)


def ssam_forward(x, conv_w, conv_b,
                 bn_max_w, bn_max_b, bn_max_mean, bn_max_var,
                 bn_avg_w, bn_avg_b, bn_avg_mean, bn_avg_var,
                 gamma, eps=1e-5):
    B, C, H, W = x.shape

    # Fold BN (eval mode) and conv bias into per-channel scale / shift.
    sm = bn_max_w / jnp.sqrt(bn_max_var + eps)
    sa = bn_avg_w / jnp.sqrt(bn_avg_var + eps)
    bm = conv_b * sm + (bn_max_b - bn_max_mean * sm)
    ba = conv_b * sa + (bn_avg_b - bn_avg_mean * sa)

    w2 = conv_w.reshape(C, C).astype(jnp.float32)
    sm2 = sm.reshape(C, 1).astype(jnp.float32)
    bm2 = bm.reshape(C, 1).astype(jnp.float32)
    sa2 = sa.reshape(C, 1).astype(jnp.float32)
    ba2 = ba.reshape(C, 1).astype(jnp.float32)
    g1 = jnp.reshape(gamma, (1,)).astype(jnp.float32)

    # H-tiling: ~2 MiB f32 x-block budget => double-buffered in+out blocks plus
    # f32 temporaries stay well inside every generation's scoped-VMEM limit.
    TH = _pick_h_tile(C, H, W, budget_bytes=2 * 1024 * 1024)
    n_h = H // TH

    itemsize = jnp.dtype(x.dtype).itemsize
    io_block = C * TH * W * itemsize          # one x / out block
    f32_block = C * TH * W * 4                # in-kernel f32 temporaries
    vmem_limit = int(min(64 << 20,
                         max(32 << 20,
                             4 * io_block + 4 * f32_block + (2 << 20))))

    cost = pl.CostEstimate(
        flops=int(B * (4 * C * C * H + 8 * C * H * W + 16 * C * H)),
        transcendentals=int(B * (C * H + H)),
        bytes_accessed=int(2 * B * C * H * W * itemsize + (C * C + 4 * C + 1) * 4),
    )

    grid_spec = pltpu.PrefetchScalarGridSpec(
        num_scalar_prefetch=0,
        grid=(B, n_h),
        in_specs=[
            pl.BlockSpec((1, C, TH, W), lambda b, h: (b, 0, h, 0)),   # x
            pl.BlockSpec((C, C), lambda b, h: (0, 0)),                # conv weight
            pl.BlockSpec((C, 1), lambda b, h: (0, 0)),                # bn_max scale
            pl.BlockSpec((C, 1), lambda b, h: (0, 0)),                # max shift
            pl.BlockSpec((C, 1), lambda b, h: (0, 0)),                # bn_avg scale
            pl.BlockSpec((C, 1), lambda b, h: (0, 0)),                # avg shift
            pl.BlockSpec(memory_space=pltpu.MemorySpace.SMEM),        # gamma
        ],
        out_specs=pl.BlockSpec((1, C, TH, W), lambda b, h: (b, 0, h, 0)),
    )

    return pl.pallas_call(
        ssam_kernel,
        out_shape=jax.ShapeDtypeStruct((B, C, H, W), x.dtype),
        grid_spec=grid_spec,
        compiler_params=pltpu.CompilerParams(
            dimension_semantics=("parallel", "parallel"),
            vmem_limit_bytes=vmem_limit),
        cost_estimate=cost,
    )(x, w2, sm2, bm2, sa2, ba2, g1)


def ssam_ref(x, conv_w, conv_b,
             bn_max_w, bn_max_b, bn_max_mean, bn_max_var,
             bn_avg_w, bn_avg_b, bn_avg_mean, bn_avg_var,
             gamma, eps=1e-5):
    # Pure-JAX reference mirroring the PyTorch forward (BN in eval mode).
    mp = jnp.max(x, axis=-1)                              # (B, C, H)
    ap = jnp.mean(x, axis=-1)
    mp = jnp.einsum('oc,bch->boh', conv_w, mp) + conv_b[None, :, None]
    ap = jnp.einsum('oc,bch->boh', conv_w, ap) + conv_b[None, :, None]
    sm = bn_max_w / jnp.sqrt(bn_max_var + eps)
    tm = bn_max_b - bn_max_mean * sm
    sa = bn_avg_w / jnp.sqrt(bn_avg_var + eps)
    ta = bn_avg_b - bn_avg_mean * sa
    mp = mp * sm[None, :, None] + tm[None, :, None]
    ap = ap * sa[None, :, None] + ta[None, :, None]
    att = jax.nn.softmax(mp * ap, axis=1)
    f_scale = att * mp + att * ap                         # (B, C, H)
    out = jax.nn.relu(gamma * f_scale[..., None] + (1.0 - gamma) * x)
    return out


if __name__ == "__main__":
    B, C, H, W = 2, 4, 16, 16  # in_channels == out_channels == C (required by
                               # the residual add / BatchNorm2d(in_channels))
    key = jax.random.PRNGKey(0)
    keys = jax.random.split(key, 8)

    x = jax.random.normal(keys[0], (B, C, H, W), dtype=jnp.float32)

    # Deterministic parameter init (synthetic, not a checkpoint).
    conv_w = jax.random.normal(keys[1], (C, C), dtype=jnp.float32) * 0.2
    conv_b = jax.random.normal(keys[2], (C,), dtype=jnp.float32) * 0.1
    bn_max_w = 1.0 + 0.1 * jax.random.normal(keys[3], (C,), dtype=jnp.float32)
    bn_max_b = 0.05 * jnp.arange(C, dtype=jnp.float32)
    bn_max_mean = 0.1 * jax.random.normal(keys[4], (C,), dtype=jnp.float32)
    bn_max_var = 1.0 + 0.1 * jnp.abs(
        jax.random.normal(keys[5], (C,), dtype=jnp.float32))
    bn_avg_w = 1.0 + 0.1 * jax.random.normal(keys[6], (C,), dtype=jnp.float32)
    bn_avg_b = -0.05 * jnp.arange(C, dtype=jnp.float32)
    bn_avg_mean = 0.1 * jax.random.normal(keys[7], (C,), dtype=jnp.float32)
    bn_avg_var = jnp.full((C,), 1.2, dtype=jnp.float32)
    # nn.Parameter(torch.zeros(1)) initializes gamma to 0 (=> out == relu(x));
    # use a nonzero deterministic value so the attention path is exercised.
    gamma = jnp.float32(0.3)

    args = (x, conv_w, conv_b,
            bn_max_w, bn_max_b, bn_max_mean, bn_max_var,
            bn_avg_w, bn_avg_b, bn_avg_mean, bn_avg_var,
            gamma)

    out = jax.block_until_ready(ssam_forward(*args))
    ref = jax.block_until_ready(ssam_ref(*args))

    assert out.shape == (B, C, H, W)
    # Tolerance is loosened vs. exact-divide softmax because the kernel uses the
    # EUP approximate reciprocal (relative error ~1e-4) for the softmax denom.
    assert jnp.allclose(out, ref, atol=2e-3, rtol=2e-3), "mismatch vs reference"
    print("KERNEL_OK")
</pallas_src>

<mosaic_0001>
module attributes {stable_mosaic.version = 11 : i64} {
  func.func @ssam_kernel(%arg0: i32, %arg1: i32, %arg2: memref<1x4x16x16xf32, #tpu.memory_space<vmem>>, %arg3: memref<4x4xf32, #tpu.memory_space<vmem>>, %arg4: memref<4x1xf32, #tpu.memory_space<vmem>>, %arg5: memref<4x1xf32, #tpu.memory_space<vmem>>, %arg6: memref<4x1xf32, #tpu.memory_space<vmem>>, %arg7: memref<4x1xf32, #tpu.memory_space<vmem>>, %arg8: memref<1xf32, #tpu.memory_space<smem>>, %arg9: memref<1x4x16x16xf32, #tpu.memory_space<vmem>>) attributes {dimension_semantics = [#tpu.dimension_semantics<parallel>, #tpu.dimension_semantics<parallel>], iteration_bounds = array<i64: 2, 1>, scalar_prefetch = 0 : i64, scratch_operands = 0 : i64, tpu.core_type = #tpu.core_type<tc>, window_params = [{transform_indices = @transform_0, window_bounds = array<i64: 1, 4, 16, 16>}, {pipeline_mode = #tpu.pipeline_mode<synchronous>, transform_indices = @transform_1, window_bounds = array<i64: 4, 4>}, {pipeline_mode = #tpu.pipeline_mode<synchronous>, transform_indices = @transform_2, window_bounds = array<i64: 4, 1>}, {pipeline_mode = #tpu.pipeline_mode<synchronous>, transform_indices = @transform_3, window_bounds = array<i64: 4, 1>}, {pipeline_mode = #tpu.pipeline_mode<synchronous>, transform_indices = @transform_4, window_bounds = array<i64: 4, 1>}, {pipeline_mode = #tpu.pipeline_mode<synchronous>, transform_indices = @transform_5, window_bounds = array<i64: 4, 1>}, {transform_indices = @transform_6, window_bounds = array<i64: 1>}, {transform_indices = @transform_7, window_bounds = array<i64: 1, 4, 16, 16>}]} {
    %c0 = arith.constant 0 : index
    %c0_0 = arith.constant 0 : index
    %c0_1 = arith.constant 0 : index
    %c0_2 = arith.constant 0 : index
    %0 = vector.load %arg2[%c0, %c0_0, %c0_1, %c0_2] : memref<1x4x16x16xf32, #tpu.memory_space<vmem>>, vector<1x4x16x16xf32>
    %1 = vector.shape_cast %0 : vector<1x4x16x16xf32> to vector<4x16x16xf32>
    %cst = arith.constant dense<0xFF800000> : vector<4x16xf32>
    %2 = vector.multi_reduction <maximumf>, %1, %cst [2] : vector<4x16x16xf32> to vector<4x16xf32>
    %cst_3 = arith.constant dense<0.000000e+00> : vector<4x16xf32>
    %3 = vector.multi_reduction <add>, %1, %cst_3 [2] : vector<4x16x16xf32> to vector<4x16xf32>
    %cst_4 = arith.constant 1.600000e+01 : f32
    %4 = vector.broadcast %cst_4 : f32 to vector<4x16xf32>
    %5 = arith.divf %3, %4 : vector<4x16xf32>
    %6 = tpu.concatenate %2, %5 in 1 : vector<4x16xf32>, vector<4x16xf32> -> vector<4x32xf32>
    %c0_5 = arith.constant 0 : index
    %c0_6 = arith.constant 0 : index
    %7 = vector.load %arg3[%c0_5, %c0_6] : memref<4x4xf32, #tpu.memory_space<vmem>>, vector<4x4xf32>
    %cst_7 = arith.constant dense<0.000000e+00> : vector<4x32xf32>
    %8 = tpu.matmul %7, %6, %cst_7 {dimension_numbers = #tpu.dot_dimension_numbers<[1], [0], [0], [1], [0, 0, 1, 1], [], []>} : vector<4x4xf32>, vector<4x32xf32>, vector<4x32xf32> -> vector<4x32xf32>
    %9 = vector.extract_strided_slice %8 {offsets = [0, 0], sizes = [4, 16], strides = [1, 1]} : vector<4x32xf32> to vector<4x16xf32>
    %c0_8 = arith.constant 0 : index
    %c0_9 = arith.constant 0 : index
    %10 = vector.load %arg4[%c0_8, %c0_9] : memref<4x1xf32, #tpu.memory_space<vmem>>, vector<4x1xf32>
    %11 = vector.broadcast %10 : vector<4x1xf32> to vector<4x16xf32>
    %12 = arith.mulf %9, %11 : vector<4x16xf32>
    %c0_10 = arith.constant 0 : index
    %c0_11 = arith.constant 0 : index
    %13 = vector.load %arg5[%c0_10, %c0_11] : memref<4x1xf32, #tpu.memory_space<vmem>>, vector<4x1xf32>
    %14 = vector.broadcast %13 : vector<4x1xf32> to vector<4x16xf32>
    %15 = arith.addf %12, %14 : vector<4x16xf32>
    %16 = vector.extract_strided_slice %8 {offsets = [0, 16], sizes = [4, 16], strides = [1, 1]} : vector<4x32xf32> to vector<4x16xf32>
    %c0_12 = arith.constant 0 : index
    %c0_13 = arith.constant 0 : index
    %17 = vector.load %arg6[%c0_12, %c0_13] : memref<4x1xf32, #tpu.memory_space<vmem>>, vector<4x1xf32>
    %18 = vector.broadcast %17 : vector<4x1xf32> to vector<4x16xf32>
    %19 = arith.mulf %16, %18 : vector<4x16xf32>
    %c0_14 = arith.constant 0 : index
    %c0_15 = arith.constant 0 : index
    %20 = vector.load %arg7[%c0_14, %c0_15] : memref<4x1xf32, #tpu.memory_space<vmem>>, vector<4x1xf32>
    %21 = vector.broadcast %20 : vector<4x1xf32> to vector<4x16xf32>
    %22 = arith.addf %19, %21 : vector<4x16xf32>
    %23 = arith.mulf %15, %22 : vector<4x16xf32>
    %cst_16 = arith.constant dense<0xFF800000> : vector<16xf32>
    %24 = vector.multi_reduction <maximumf>, %23, %cst_16 [0] : vector<4x16xf32> to vector<16xf32>
    %25 = vector.shape_cast %24 : vector<16xf32> to vector<1x16xf32>
    %26 = vector.broadcast %25 : vector<1x16xf32> to vector<4x16xf32>
    %27 = arith.subf %23, %26 : vector<4x16xf32>
    %28 = math.exp %27 : vector<4x16xf32>
    %cst_17 = arith.constant dense<0.000000e+00> : vector<16xf32>
    %29 = vector.multi_reduction <add>, %28, %cst_17 [0] : vector<4x16xf32> to vector<16xf32>
    %30 = vector.shape_cast %29 : vector<16xf32> to vector<1x16xf32>
    %31 = tpu.reciprocal %30 {approx = true} : vector<1x16xf32> -> vector<1x16xf32>
    %32 = vector.broadcast %31 : vector<1x16xf32> to vector<4x16xf32>
    %33 = arith.mulf %28, %32 : vector<4x16xf32>
    %34 = arith.addf %15, %22 : vector<4x16xf32>
    %35 = arith.mulf %33, %34 : vector<4x16xf32>
    %c0_18 = arith.constant 0 : index
    %36 = memref.load %arg8[%c0_18] : memref<1xf32, #tpu.memory_space<smem>>
    %37 = vector.shape_cast %35 : vector<4x16xf32> to vector<4x16x1xf32>
    %38 = vector.broadcast %36 : f32 to vector<4x16x1xf32>
    %39 = arith.mulf %38, %37 : vector<4x16x1xf32>
    %cst_19 = arith.constant 1.000000e+00 : f32
    %40 = arith.subf %cst_19, %36 : f32
    %c0_20 = arith.constant 0 : index
    %c0_21 = arith.constant 0 : index
    %c0_22 = arith.constant 0 : index
    %c0_23 = arith.constant 0 : index
    %41 = vector.load %arg2[%c0_20, %c0_21, %c0_22, %c0_23] : memref<1x4x16x16xf32, #tpu.memory_space<vmem>>, vector<1x4x16x16xf32>
    %42 = vector.shape_cast %41 : vector<1x4x16x16xf32> to vector<4x16x16xf32>
    %43 = vector.broadcast %40 : f32 to vector<4x16x16xf32>
    %44 = arith.mulf %43, %42 : vector<4x16x16xf32>
    %45 = vector.broadcast %39 : vector<4x16x1xf32> to vector<4x16x16xf32>
    %46 = arith.addf %45, %44 : vector<4x16x16xf32>
    %cst_24 = arith.constant 0.000000e+00 : f32
    %47 = vector.broadcast %cst_24 : f32 to vector<4x16x16xf32>
    %48 = arith.maximumf %46, %47 : vector<4x16x16xf32>
    %c0_25 = arith.constant 0 : index
    %c0_26 = arith.constant 0 : index
    %c0_27 = arith.constant 0 : index
    %c0_28 = arith.constant 0 : index
    %49 = vector.load %arg9[%c0_25, %c0_26, %c0_27, %c0_28] : memref<1x4x16x16xf32, #tpu.memory_space<vmem>>, vector<1x4x16x16xf32>
    %50 = vector.shape_cast %49 : vector<1x4x16x16xf32> to vector<4x16x16xf32>
    %51 = vector.shape_cast %48 : vector<4x16x16xf32> to vector<1x4x16x16xf32>
    tpu.vector_store %arg9[%c0_25, %c0_26, %c0_27, %c0_28], %51 {strides = array<i32>} : memref<1x4x16x16xf32, #tpu.memory_space<vmem>>, vector<1x4x16x16xf32>,
    return
  }
  func.func @transform_0(%arg0: i32, %arg1: i32) -> (i32, i32, i32, i32) {
    %c0_i32 = arith.constant 0 : i32
    %c0_i32_0 = arith.constant 0 : i32
    %c0_i32_1 = arith.constant 0 : i32
    return %arg0, %c0_i32, %arg1, %c0_i32_0 : i32, i32, i32, i32
  }
  func.func @transform_1(%arg0: i32, %arg1: i32) -> (i32, i32) {
    %c0_i32 = arith.constant 0 : i32
    %c0_i32_0 = arith.constant 0 : i32
    %c0_i32_1 = arith.constant 0 : i32
    return %c0_i32, %c0_i32_0 : i32, i32
  }
  func.func @transform_2(%arg0: i32, %arg1: i32) -> (i32, i32) {
    %c0_i32 = arith.constant 0 : i32
    %c0_i32_0 = arith.constant 0 : i32
    %c0_i32_1 = arith.constant 0 : i32
    return %c0_i32, %c0_i32_0 : i32, i32
  }
  func.func @transform_3(%arg0: i32, %arg1: i32) -> (i32, i32) {
    %c0_i32 = arith.constant 0 : i32
    %c0_i32_0 = arith.constant 0 : i32
    %c0_i32_1 = arith.constant 0 : i32
    return %c0_i32, %c0_i32_0 : i32, i32
  }
  func.func @transform_4(%arg0: i32, %arg1: i32) -> (i32, i32) {
    %c0_i32 = arith.constant 0 : i32
    %c0_i32_0 = arith.constant 0 : i32
    %c0_i32_1 = arith.constant 0 : i32
    return %c0_i32, %c0_i32_0 : i32, i32
  }
  func.func @transform_5(%arg0: i32, %arg1: i32) -> (i32, i32) {
    %c0_i32 = arith.constant 0 : i32
    %c0_i32_0 = arith.constant 0 : i32
    %c0_i32_1 = arith.constant 0 : i32
    return %c0_i32, %c0_i32_0 : i32, i32
  }
  func.func @transform_6(%arg0: i32, %arg1: i32) -> i32 {
    %c0_i32 = arith.constant 0 : i32
    %c0_i32_0 = arith.constant 0 : i32
    return %c0_i32 : i32
  }
  func.func @transform_7(%arg0: i32, %arg1: i32) -> (i32, i32, i32, i32) {
    %c0_i32 = arith.constant 0 : i32
    %c0_i32_0 = arith.constant 0 : i32
    %c0_i32_1 = arith.constant 0 : i32
    return %arg0, %c0_i32, %arg1, %c0_i32_0 : i32, i32, i32, i32
  }
}

</mosaic_0001>

<bundles_post_ra>
// kernel: tpu_custom_call.1
= control target key start
LH: loop header
LB: loop body
LE: loop exit
PB: predicated region body
PF: predicated region fallthrough
CT: control target
= control target key end

     0   :  { %s1234_s0 = inlined_call_operand.hbm [shape: f32[2,4,16,16], index: 0, kind: input, shape index: {}]   ;;  %s1235_s1 = inlined_call_operand.vmem [shape: f32[4,4], index: 1, kind: input, shape index: {}]   ;;  %s1236_s2 = inlined_call_operand.vmem [shape: f32[4,1], index: 2, kind: input, shape index: {}]   ;;  %s1237_s3 = inlined_call_operand.vmem [shape: f32[4,1], index: 3, kind: input, shape index: {}]   ;;  %s1238_s4 = inlined_call_operand.vmem [shape: f32[4,1], index: 4, kind: input, shape index: {}]   ;;  %s1239_s5 = inlined_call_operand.vmem [shape: f32[4,1], index: 5, kind: input, shape index: {}]   ;;  %s1240_s6 = inlined_call_operand.<no memory space> [shape: f32[1], index: 6, kind: input, shape index: {}]   ;;  %s1241_s7 = inlined_call_operand.hbm [shape: f32[2,4,16,16], index: 7, kind: output, shape index: {}]  }
   0x1   :  { %12 = sst [smem:[#allocation2]] %s1240_s6 }
   0x2   :  { %13 = vsyncpa [#allocation4], 0 }
   0x3   :  { %15 = vsyncpa [#allocation4 + $0x1], 0 }
   0x4   :  { %16 = vsyncpa [#allocation5], 0 }
   0x5   :  { %18 = vsyncpa [#allocation5 + $0x1], 0  ;;  %s1003_s26 = smov 0   ;;  %s1005_s27 = smov 0  }
   0x6   :  { %s1007_s28 = smov 0   ;;  %s1009_s29 = smov 0  }
   0x7   :  { %s1011_s30 = smov 0   ;;  %s1013_s8 = smov 0  }
   0x8 LB: > { %s736_s6 = sadd.s32 4294967295, %s951_s8   ;;  %s737_s9 = sadd.s32 4294967294, %s951_s8   ;;  %s951_s8 = sphi %s1013_s8, %s24_s8   ;;  %s947_s30 = sphi %s1011_s30, %s1253_s30   ;;  %s943_s29 = sphi %s1009_s29, %s1252_s29   ;;  %s939_s28 = sphi %s1007_s28, %s1251_s28   ;;  %s935_s27 = sphi %s1005_s27, %s1250_s27   ;;  %s931_s26 = sphi %s1003_s26, %s1249_s26  }
   0x9   : > { %s36_s10 = sadd.s32 1, %s947_s30  ;;  %s45_s11 = sadd.s32 1, %s939_s28 }
   0xa   : > { %p38_p0 = scmp.ge.s32.totalorder %s36_s10, 2  ;;  %p52_p1 = scmp.ne.s32.totalorder %s939_s28, %s935_s27 }
   0xb   : > { %p53_p2 = scmp.eq.s32.totalorder %s951_s8, 0  ;;  %p58_p3 = scmp.ne.s32.totalorder %s935_s27, %s931_s26 }
   0xc   : > { %s1255_s10 = smov (%p38_p0, %s36_s10), 0  ;;  %p59_p5 = scmp.eq.s32.totalorder %s736_s6, 0 }
   0xd   : > { %1243 = sst [smem:[#allocation9_spill]] %s1255_s10  ;;  %p1044_p4 = por %p53_p2, %p52_p1 }
   0xe   : > { %s40_s13 = ssub.s32 %s947_s30, %s1255_s10  ;;  %p210_p6 = scmp.eq.s32.totalorder %s736_s6, 1 }
   0xf   : > { %p43_p7 = scmp.eq.s32.totalorder %s40_s13, 0  ;;  %p1050_p8 = por %p59_p5, %p58_p3 }
  0x10   : > { %p1054_p9 = por %p210_p6, %p52_p1  ;;  %p216_p10 = scmp.eq.s32.totalorder %s737_s9, 1 }
  0x11   : > { %s1059_s16 = scalar_select %p43_p7, %s939_s28, %s45_s11  }
  0x12   : > { %p1061_p11 = por %p216_p10, %p58_p3  ;;  %p739_p12 = scmp.ge.s32.totalorder %s951_s8, 2 }
  0x13   : > { %p767_p13 = scmp.lt.s32.totalorder %s951_s8, 2  ;;  %s254_s18 = sand.u32 1, %s939_s28  }
  0x14   : > { %s740_s19 = sshll.u32 %s254_s18, 6  ;;  %s753_s20 = sshll.u32 %s947_s30, 6 }
  0x15   : > { %s265_s23 = scalar_lea.hbm %s1234_s0, %s753_s20  ;;  %s258_s24 = scalar_lea.vmem [#allocation3], %s740_s19 }
  0x16   : > { %s268_s25 = sshll.u32 %s258_s24, 4  ;;  %s266_s6 = sshll.u32 %s265_s23, 4  ;;  %s269_s25 = int_to_ptr.vmem [resolvable:$true] %s268_s25  ;;  %s267_s6 = int_to_ptr.hbm [resolvable:$true] %s266_s6 }
  0x17   : > { %p760_p0 = pnand %p767_p13, %p1044_p4  ;;  %p743_p1 = scmp.ge.s32.totalorder %s951_s8, 1 }
  0x18   : > { %s255_s9 = scalar_lea.sflag [#allocation4], %s254_s18  ;;  %s953_s11 = smov 128  }
  0x19   : > { %s954_s13 = smov 8   ;;  %p276_p2 = scmp.lt.s32.totalorder %s951_s8, 3 }
  0x1a   : > { %762 = dma.hbm_to_vmem [thread:$0]  (!%p760_p0), %s267_s6, 1024, %s269_s25, %s255_s9, %s953_s11, %s953_s11, %s954_s13  }
  0x1b   : > { %p277_p3 = pnand %p743_p1, %p276_p2 }
  0x1c   : > { %s1077_s10 = sand.u32 (!%p277_p3), 1, %s935_s27  }
  0x1d   : > { %280 = sbr.rel (%p277_p3) target bundleno = 646 (0x286), region = 48  ;;  %s744_s19 = sshll.u32 (!%p277_p3), %s1077_s10, 6 }
  0x1e   : > { %s283_s20 = scalar_lea.sflag (!%p277_p3), [#allocation4], %s1077_s10  ;;  %s286_s12 = scalar_lea.vmem (!%p277_p3), [#allocation3], %s744_s19 }
  0x22   : > { %922 = dma.done.wait (%p1050_p8), %s283_s20, 1024  }
  0x23   : > { %924 = vsyncadd (%p1050_p8), %s283_s20, 4294966272  ;;  %vm328_vm0 = vcmask 130048   ;;  %v1087_v0 = vld [vmem:[%s286_s12 + $0x20] sm:$0xff]  ;;  %v1089_v1 = vld [vmem:[%s286_s12 + $0x10] sm:$0xff]  ;;  %v955_v27 = vmov 16.0   ;;  %v956_v38 = vmov 0   ;;  %v400_v42 = vlaneseq }
  0x24   : > { %v1091_v2 = vld [vmem:[%s286_s12] sm:$0xff]  ;;  %v365_v3 = vsel %vm328_vm0, %v1087_v0, 0.0  ;;  %v359_v4 = vsel %vm328_vm0, %v1089_v1, 0.0  ;;  %v1099_v6 = vld [vmem:[%s286_s12 + $0x28] sm:$0xff]  ;;  %v1101_v7 = vld [vmem:[%s286_s12 + $0x18] sm:$0xff]  ;;  %v335_v12 = vsel %vm328_vm0, %v1089_v1, -inf  ;;  %833 = vrcp.f32 %v955_v27  ;;  %826 = vset.pattern.permute.xlu0 %v956_v38  ;;  %824 = vset.pattern.permute.xlu1 %v956_v38 }
  0x25   : > { %v353_v5 = vsel %vm328_vm0, %v1091_v2, 0.0  ;;  %366 = vadd.xlane.f32.xlu2 %v365_v3  ;;  %360 = vadd.xlane.f32.xlu1 %v359_v4  ;;  %v1103_v8 = vld [vmem:[%s286_s12 + $0x8] sm:$0xff]  ;;  %v368_v9 = vsel %vm328_vm0, %v1099_v6, 0.0  ;;  %v362_v10 = vsel %vm328_vm0, %v1101_v7, 0.0  ;;  %v329_v14 = vsel %vm328_vm0, %v1091_v2, -inf  ;;  %v1117_v15 = vld [vmem:[%s286_s12 + $0x38] sm:$0xff] }
  0x26   : > { %354 = vadd.xlane.f32.xlu0 %v353_v5  ;;  %v356_v11 = vsel %vm328_vm0, %v1103_v8, 0.0  ;;  %v332_v13 = vsel %vm328_vm0, %v1103_v8, -inf  ;;  %v1119_v16 = vld [vmem:[%s286_s12 + $0x30] sm:$0xff]  ;;  %v374_v17 = vsel %vm328_vm0, %v1117_v15, 0.0  ;;  %v338_v19 = vsel %vm328_vm0, %v1101_v7, -inf  ;;  %825 = vset.pattern.permute.xlu2 %v956_v38  ;;  %s957_s13 = smov 112  }
  0x27   : > { %v371_v18 = vsel %vm328_vm0, %v1119_v16, 0.0  ;;  %v344_v20 = vsel %vm328_vm0, %v1099_v6, -inf  ;;  %v347_v21 = vsel %vm328_vm0, %v1119_v16, -inf  ;;  %v341_v22 = vsel %vm328_vm0, %v1087_v0, -inf  ;;  %v494_v35 = vld [vmem:[%s1238_s4] sm:$0xf] }
  0x28   : > { %v350_v23 = vsel %vm328_vm0, %v1117_v15, -inf  ;;  %v480_v36 = vld [vmem:[%s1236_s2] sm:$0xf]  ;;  %v401_v47 = vand.u32 127, %v400_v42  ;;  %vm435_vm2 = vcmask 261312   ;;  %vm416_vm3 = vcmask 1041409  }
  0x29   : > { %v501_v39 = vld [vmem:[%s1239_s5] sm:$0xf]  ;;  %vm405_vm4 = vcmask 130112   ;;  %vm418_vm5 = vcmask 1042434   ;;  %vm420_vm6 = vcmask 1043459   ;;  %vm456_vm7 = vcmask 1043456  }
  0x2a   : > { %v834_v29 = vpop.eup %833  ;;  %v487_v46 = vld [vmem:[%s1237_s3] sm:$0xf]  ;;  %v433_v50 = vadd.s32 4294967272, %v401_v47  ;;  %v431_v54 = vadd.s32 4294967280, %v401_v47  ;;  %v403_v62 = vadd.s32 4294967288, %v401_v47  ;;  %vm452_vm8 = vcmask 31744  }
  0x2b   : > { %v378_v32 = vmul.f32 16.0, %v834_v29  ;;  %vm382_vm1 = vweird.f32 %v834_v29  ;;  %vm513_vm9 = vcmask 125952   ;;  %s535_s20 = sld [smem:[#allocation2]]  ;;  %s1171_s14 = scalar_lea.vmem [#allocation6], %s744_s19 }
  0x2c   : > { %s754_s19 = sshll.u32 %s943_s29, 6  ;;  %s646_s23 = sshll.u32 %s1171_s14, 4  ;;  %s647_s23 = int_to_ptr.vmem [resolvable:$true] %s646_s23 }
  0x2d   : > { %369 = vadd.xlane.f32.xlu2 %v368_v9  ;;  %363 = vadd.xlane.f32.xlu1 %v362_v10  ;;  %v379_v33 = vsub.f32 1.0, %v378_v32  ;;  %s645_s22 = scalar_lea.hbm %s1241_s7, %s754_s19  ;;  %s632_s25 = scalar_lea.sflag [#allocation5], %s1077_s10 }
  0x2e   : > { %357 = vadd.xlane.f32.xlu0 %v356_v11  ;;  %s648_s24 = sshll.u32 %s645_s22, 4  ;;  %s649_s24 = int_to_ptr.hbm [resolvable:$true] %s648_s24 }
  0x2f   : > { %v380_v41 = vmul.f32 %v834_v29, %v379_v33  ;;  %s883_s6 = sshra.s32 %s649_s24, 4  ;;  %s884_s6 = int_to_ptr.hbm [resolvable:$true] %s883_s6 }
  0x30   : > { %s885_s29 = scalar_lea.hbm %s884_s6, 64  ;;  %p890_p7 = scmp.lt.s32.totalorder %s884_s6, %s1241_s7 }
  0x31   : > { %v381_v43 = vadd.f32 %v834_v29, %v380_v41  ;;  %s597_s12 = ssub.f32 1.0, %s535_s20  ;;  %p886_p4 = scmp.ne.s32.totalorder %s884_s6, %s885_s29 }
  0x33   : > { %v383_v48 = vsel %vm382_vm1, %v834_v29, %v381_v43  ;;  %p887_p5 = pnand %p886_p4, %p1054_p9 }
  0x35   : > { %336 = vmax.xlane.f32.xlu2 %v335_v12  ;;  %333 = vmax.xlane.f32.xlu1 %v332_v13  ;;  %p888_p6 = pneg %p887_p5 }
  0x36   : > { %330 = vmax.xlane.f32.xlu0 %v329_v14 }
  0x3d   : > { %375 = vadd.xlane.f32.xlu2 %v374_v17  ;;  %372 = vadd.xlane.f32.xlu1 %v371_v18 }
  0x3e   : > { %339 = vmax.xlane.f32.xlu0 %v338_v19 }
  0x45   : > { %345 = vmax.xlane.f32.xlu1 %v344_v20  ;;  %348 = vmax.xlane.f32.xlu2 %v347_v21 }
  0x46   : > { %342 = vmax.xlane.f32.xlu0 %v341_v22 }
  0x4e   : > { %351 = vmax.xlane.f32.xlu0 %v350_v23 }
  0x5d   : > { %504 = vperm.xlu2 %825, %v501_v39   ;;  %v451_v39 = vld [vmem:[%s1235_s1] sm:$0xf] }
  0x5e   : > { %497 = vperm.xlu1 %824, %v494_v35  }
  0x62   : > { %483 = vperm.xlu0 %826, %v480_v36  }
  0x65   : > { %490 = vperm.xlu2 %825, %v487_v46  }
  0x98   : > { %v367_v24 = vpop.xlane.xlu2 %366  ;;  %v361_v25 = vpop.xlane.xlu1 %360 }
  0x99   : > { %v355_v26 = vpop.xlane.xlu0 %354  ;;  %v386_v49 = vmul.f32 %v383_v48, %v361_v25  ;;  %v388_v56 = vmul.f32 %v383_v48, %v367_v24 }
  0x9a   : > { %v384_v55 = vmul.f32 %v383_v48, %v355_v26 }
  0x9b   : > { %v437_v58 = vperm.slane %v386_v49, %v431_v54  ;;  %v440_v9 = vperm.slane %v388_v56, %v431_v54 }
  0x9c   : > { %v432_v5 = vperm.slane %v384_v55, %v431_v54 }
  0xa0   : > { %v364_v28 = vpop.xlane.xlu1 %363  ;;  %v370_v30 = vpop.xlane.xlu2 %369 }
  0xa1   : > { %v358_v31 = vpop.xlane.xlu0 %357  ;;  %v387_v51 = vmul.f32 %v383_v48, %v364_v28  ;;  %v389_v57 = vmul.f32 %v383_v48, %v370_v30 }
  0xa2   : > { %v385_v52 = vmul.f32 %v383_v48, %v358_v31 }
  0xa3   : > { %v438_v59 = vperm.slane %v387_v51, %v433_v50  ;;  %v441_v10 = vperm.slane %v389_v57, %v433_v50  ;;  %v538_v57 = vshrl.u32 %v400_v42, 7 }
  0xa4   : > { %v434_v60 = vperm.slane %v385_v52, %v433_v50 }
  0xa5   : > { %v439_v13 = vsel %vm435_vm2, %v438_v59, %v437_v58  ;;  %v442_v26 = vsel %vm435_vm2, %v441_v10, %v440_v9  ;;  %827 = vset.pattern.permute.xlu2 %v538_v57  ;;  %v545_v59 = vadd.s32 8, %v538_v57  ;;  %829 = vset.pattern.permute.xlu0 %v538_v57 }
  0xa6   : > { %v436_v14 = vsel %vm435_vm2, %v434_v60, %v432_v5 }
  0xa7   : > { %v446_v29 = vsel %vm416_vm3, %v439_v13, %v436_v14  ;;  %828 = vset.pattern.permute.xlu1 %v545_v59 }
  0xa8   : > { %v1135_v34 = vpop.xlane.xlu1 %333  ;;  %v337_v40 = vpop.xlane.xlu2 %336  ;;  %v447_v36 = vsel %vm418_vm5, %v442_v26, %v446_v29 }
  0xa9   : > { %v1143_v37 = vpop.xlane.xlu0 %330  ;;  %v407_v11 = vperm.slane %v337_v40, %v401_v47  ;;  %v404_v20 = vperm.slane %v1135_v34, %v403_v62 }
  0xaa   : > { %v402_v21 = vperm.slane %v1143_v37, %v401_v47 }
  0xac   : > { %v406_v30 = vsel %vm405_vm4, %v404_v20, %v402_v21 }
  0xb0   : > { %v373_v44 = vpop.xlane.xlu1 %372  ;;  %v376_v53 = vpop.xlane.xlu2 %375 }
  0xb1   : > { %v340_v45 = vpop.xlane.xlu0 %339  ;;  %v391_v63 = vmul.f32 %v383_v48, %v376_v53  ;;  %v390_v3 = vmul.f32 %v383_v48, %v373_v44 }
  0xb2   : > { %v408_v12 = vperm.slane %v340_v45, %v403_v62 }
  0xb3   : > { %v444_v22 = vperm.slane %v391_v63, %v433_v50  ;;  %v443_v23 = vperm.slane %v390_v3, %v431_v54 }
  0xb4   : > { %v409_v24 = vsel %vm405_vm4, %v408_v12, %v407_v11 }
  0xb5   : > { %v445_v32 = vsel %vm435_vm2, %v444_v22, %v443_v23  ;;  %v417_v33 = vsel %vm416_vm3, %v409_v24, %v406_v30  ;;  %v598_v23 = vstv %s597_s12  ;;  %v588_v24 = vstv %s535_s20 }
  0xb6   : > { %v448_v38 = vsel %vm420_vm6, %v445_v32, %v447_v36  ;;  %v601_v30 = vmul.f32 %v598_v23, %v1089_v1 }
  0xb8   : > { %v346_v4 = vpop.xlane.xlu1 %345  ;;  %v349_v19 = vpop.xlane.xlu2 %348 }
  0xb9   : > { %v343_v61 = vpop.xlane.xlu0 %342  ;;  %v411_v17 = vperm.slane %v346_v4, %v403_v62  ;;  %v413_v25 = vperm.slane %v349_v19, %v401_v47 }
  0xba   : > { %v410_v18 = vperm.slane %v343_v61, %v401_v47 }
  0xbc   : > { %v412_v27 = vsel %vm405_vm4, %v411_v17, %v410_v18 }
  0xbd   : > { %v419_v35 = vsel %vm418_vm5, %v412_v27, %v417_v33 }
  0xc0   : > { %v505_v45 = vpop.permute.xlu2 %504 }
  0xc1   : > { %v352_v28 = vpop.xlane.xlu0 %351 }
  0xc2   : > { %v414_v31 = vperm.slane %v352_v28, %v403_v62 }
  0xc4   : > { %v415_v34 = vsel %vm405_vm4, %v414_v31, %v413_v25  ;;  %v599_v25 = vmul.f32 %v598_v23, %v1091_v2  ;;  %v603_v2 = vmul.f32 %v598_v23, %v1087_v0 }
  0xc5   : > { %v421_v37 = vsel %vm420_vm6, %v415_v34, %v419_v35  ;;  %v600_v35 = vmul.f32 %v598_v23, %v1103_v8  ;;  %v602_v8 = vmul.f32 %v598_v23, %v1101_v7  ;;  %v605_v7 = vmul.f32 %v598_v23, %v1119_v16 }
  0xc6   : > { %v450_v40 = vsel %vm328_vm0, %v421_v37, %v448_v38  ;;  %v604_v37 = vmul.f32 %v598_v23, %v1099_v6 }
  0xc7   : > { %746 = vmatpush.msk.msra.mxu0 %vm456_vm7, %v450_v40 }
  0xc8   : > { %747 = vmatmul.msk.f32.vlgmr.msra.gmra.mxu0 %vm452_vm8, %v451_v39  ;;  %v491_v49 = vpop.permute.xlu2 %490 }
  0xd0   : > { %v498_v41 = vpop.permute.xlu1 %497 }
  0xd4   : > { %v484_v47 = vpop.permute.xlu0 %483 }
 0x145   : > { %v477_v43 = vpop.f32.mrf.mxu0 }
 0x146   : > { %v500_v44 = vmul.f32 %v498_v41, %v477_v43  ;;  %v486_v48 = vmul.f32 %v484_v47, %v477_v43 }
 0x148   : > { %v507_v46 = vadd.f32 %v505_v45, %v500_v44  ;;  %v493_v50 = vadd.f32 %v491_v49, %v486_v48  ;;  %v606_v48 = vmul.f32 %v598_v23, %v1117_v15 }
 0x14a   : > { %509 = vrot.lane.b32.xlu1 %v507_v46, %s957_s13  ;;  %s889_s13 = scalar_lea.hbm %s1241_s7, 128 }
 0x14b   : > { %p891_p8 = scmp.lt.s32.totalorder %s889_s13, %s885_s29 }
 0x14d   : > { %p892_p10 = por %p891_p8, %p890_p7 }
 0x14f   : > { %p893_p13 = pnand %p892_p10, %p888_p6 }
 0x1bc   : > { %v510_v51 = vpop.permute.xlu1 %509 }
 0x1bd   : > { %v512_v52 = vmul.f32 %v510_v51, %v493_v50  ;;  %v533_v17 = vadd.f32 %v510_v51, %v493_v50 }
 0x1bf   : > { %v514_v53 = vsel %vm513_vm9, %v512_v52, -inf }
 0x1c0   : > { %v515_v54 = vrot.slane %v514_v53, 4 }
 0x1c2   : > { %v516_v55 = vmax.f32 %v514_v53, %v515_v54 }
 0x1c4   : > { %v517_v56 = vrot.slane %v516_v55, 2 }
 0x1c6   : > { %v518_v58 = vmax.f32 %v516_v55, %v517_v56 }
 0x1c8   : > { %v519_v60 = vrot.slane %v518_v58, 1 }
 0x1ca   : > { %v520_v61 = vmax.f32 %v518_v58, %v519_v60 }
 0x1cc   : > { %v521_v62 = vsub.f32 %v512_v52, %v520_v61 }
 0x1ce   : > { %v522_v63 = vmul.f32 1.442695, %v521_v62 }
 0x1d0   : > { %835 = vpow2.f32 %v522_v63 }
 0x1d6   : > { %v836_v3 = vpop.eup %835 }
 0x1d7   : > { %v524_v4 = vsel %vm513_vm9, %v836_v3, 0.0 }
 0x1d8   : > { %v525_v5 = vrot.slane %v524_v4, 4 }
 0x1da   : > { %v526_v9 = vadd.f32 %v525_v5, %v524_v4 }
 0x1dc   : > { %v527_v10 = vrot.slane %v526_v9, 2 }
 0x1de   : > { %v528_v11 = vadd.f32 %v527_v10, %v526_v9 }
 0x1e0   : > { %v529_v12 = vrot.slane %v528_v11, 1 }
 0x1e2   : > { %v530_v13 = vadd.f32 %v529_v12, %v528_v11 }
 0x1e4   : > { %837 = vrcp.f32 %v530_v13 }
 0x1ea   : > { %v838_v42 = vpop.eup %837 }
 0x1eb   : > { %v532_v14 = vmul.f32 %v838_v42, %v836_v3 }
 0x1ed   : > { %v534_v18 = vmul.f32 %v533_v17, %v532_v14 }
 0x1ef   : > { %v562_v19 = vperm.slane %v534_v18, 2  ;;  %v536_v20 = vperm.slane %v534_v18, 0  ;;  %v549_v21 = vperm.slane %v534_v18, 1  ;;  %v575_v22 = vperm.slane %v534_v18, 3 }
 0x1f1   : > { %567 = vperm.xlu0 %829, %v562_v19   ;;  %547 = vperm.xlu1 %828, %v536_v20  }
 0x1f2   : > { %541 = vperm.xlu2 %827, %v536_v20  }
 0x1f9   : > { %560 = vperm.xlu1 %828, %v549_v21   ;;  %832 = vset.pattern.permute.xlu0 %v545_v59 }
 0x1fa   : > { %554 = vperm.xlu2 %827, %v549_v21  }
 0x201   : > { %831 = vset.pattern.permute.xlu1 %v538_v57 }
 0x202   : > { %830 = vset.pattern.permute.xlu2 %v545_v59 }
 0x209   : > { %580 = vperm.xlu1 %831, %v575_v22  }
 0x20a   : > { %573 = vperm.xlu2 %830, %v562_v19  }
 0x212   : > { %586 = vperm.xlu2 %830, %v575_v22  }
 0x24c   : > { %v542_v26 = vpop.permute.xlu2 %541 }
 0x24d   : > { %v589_v27 = vmul.f32 %v588_v24, %v542_v26 }
 0x24f   : > { %v607_v28 = vadd.f32 %v599_v25, %v589_v27 }
 0x251   : > { %v615_v29 = vmax.f32 %v607_v28, 0.0 }
 0x253   : > { %623 = vst.msk [vmem:[%s1171_s14] sm:$0xff] %vm328_vm0, %v615_v29 }
 0x254   : > { %v555_v31 = vpop.permute.xlu2 %554 }
 0x255   : > { %v591_v32 = vmul.f32 %v588_v24, %v555_v31 }
 0x257   : > { %v609_v33 = vadd.f32 %v601_v30, %v591_v32 }
 0x259   : > { %v617_v34 = vmax.f32 %v609_v33, 0.0 }
 0x25b   : > { %625 = vst.msk [vmem:[%s1171_s14 + $0x10] sm:$0xff] %vm328_vm0, %v617_v34 }
 0x263   : > { %v568_v1 = vpop.permute.xlu0 %567  ;;  %v548_v36 = vpop.permute.xlu1 %547 }
 0x264   : > { %v593_v38 = vmul.f32 %v588_v24, %v568_v1  ;;  %v590_v39 = vmul.f32 %v588_v24, %v548_v36  ;;  %v574_v40 = vpop.permute.xlu2 %573 }
 0x265   : > { %v594_v41 = vmul.f32 %v588_v24, %v574_v40 }
 0x266   : > { %v611_v43 = vadd.f32 %v603_v2, %v593_v38  ;;  %v608_v44 = vadd.f32 %v600_v35, %v590_v39 }
 0x267   : > { %v612_v45 = vadd.f32 %v604_v37, %v594_v41 }
 0x268   : > { %v619_v46 = vmax.f32 %v611_v43, 0.0  ;;  %v616_v47 = vmax.f32 %v608_v44, 0.0 }
 0x269   : > { %v620_v0 = vmax.f32 %v612_v45, 0.0 }
 0x26a   : > { %627 = vst.msk [vmem:[%s1171_s14 + $0x20] sm:$0xff] %vm328_vm0, %v619_v46 }
 0x26b   : > { %624 = vst.msk [vmem:[%s1171_s14 + $0x8] sm:$0xff] %vm328_vm0, %v616_v47  ;;  %v561_v6 = vpop.permute.xlu1 %560 }
 0x26c   : > { %628 = vst.msk [vmem:[%s1171_s14 + $0x28] sm:$0xff] %vm328_vm0, %v620_v0  ;;  %v592_v49 = vmul.f32 %v588_v24, %v561_v6  ;;  %v587_v50 = vpop.permute.xlu2 %586 }
 0x26d   : > { %v596_v51 = vmul.f32 %v588_v24, %v587_v50 }
 0x26e   : > { %v610_v52 = vadd.f32 %v602_v8, %v592_v49 }
 0x26f   : > { %v614_v53 = vadd.f32 %v606_v48, %v596_v51 }
 0x270   : > { %v618_v54 = vmax.f32 %v610_v52, 0.0 }
 0x271   : > { %v622_v55 = vmax.f32 %v614_v53, 0.0 }
 0x272   : > { %626 = vst.msk [vmem:[%s1171_s14 + $0x18] sm:$0xff] %vm328_vm0, %v618_v54 }
 0x273   : > { %630 = vst.msk [vmem:[%s1171_s14 + $0x38] sm:$0xff] %vm328_vm0, %v622_v55 }
 0x27b   : > { %v581_v15 = vpop.permute.xlu1 %580 }
 0x27c   : > { %v595_v56 = vmul.f32 %v588_v24, %v581_v15 }
 0x27e   : > { %v613_v57 = vadd.f32 %v605_v7, %v595_v56 }
 0x280   : > { %v621_v58 = vmax.f32 %v613_v57, 0.0 }
 0x282   : > { %629 = vst.msk [vmem:[%s1171_s14 + $0x30] sm:$0xff] %vm328_vm0, %v621_v58 }
 0x283   : > { %896 = shalt.err (!%p893_p13)
}
 0x284   : > { %s958_s10 = smov 128   ;;  %s959_s14 = smov 8  }
 0x285   : > { %757 = dma.vmem_to_hbm [thread:$0]  (%p1054_p9), %s647_s23, 1024, %s649_s24, %s632_s25, %s958_s10, %s958_s10, %s959_s14  }
 0x286 PF: > { %s663_s19 = sand.u32 1, %s931_s26   ;;  %p764_p0 = pnand %p739_p12, %p1061_p11 }
 0x287   : > { %s664_s18 = scalar_lea.sflag [#allocation5], %s663_s19 }
 0x288   : > { %p765_p1 = pneg %p764_p0 }
 0x28a   : > { %926 = dma.done.wait (%p765_p1), %s664_s18, 1024  }
 0x28b   : > { %928 = vsyncadd (%p765_p1), %s664_s18, 4294966272  ;;  %s24_s8 = sadd.s32 1, %s951_s8   ;;  %s1248_s15 = sld [smem:[#allocation9_spill]] }
 0x28c   : > { %p21_p2 = scmp.ge.s32.totalorder %s24_s8, 4   ;;  %s1249_s26 = smov %s935_s27 }
 0x28d   : > { %s1250_s27 = smov %s939_s28  ;;  %s1251_s28 = smov %s1059_s16 }
 0x28e   : > { %s1252_s29 = smov %s947_s30  ;;  %23 = sbr.rel (!%p21_p2) target bundleno = 8 (0x8), region = 93 }
 0x291   : > { %s1253_s30 = smov %s1248_s15 }
 0x293   :  { %670 = vsyncpa [#allocation4], 1 }
 0x294   :  { %672 = vsyncpa [#allocation4 + $0x1], 1 }
 0x295   :  { %673 = vsyncpa [#allocation5], 1 }
 0x296   :  { %675 = vsyncpa [#allocation5 + $0x1], 1 }

</bundles_post_ra>
